<compile_context>
chip_gen: v6e
topology: v6e:2x2x1
jax: 0.10.0
libtpu: 0.0.40
codegen_flags: <defaults>
</compile_context>

<pallas_src>
import jax
import jax.numpy as jnp
import numpy as np
from jax import lax
from jax.experimental import pallas as pl
from jax.experimental.pallas import tpu as pltpu

ALPHA = 0.2          # soft-label CE weight
LAMBDA_K = 0.8       # per-head decay
NEG_INF = float("-inf")
_VMEM_LIMIT = 48 * 1024 * 1024   # explicit scoped-VMEM budget (fits v7x 64 MiB)


def _pick_tile(dim, desired):
    """Largest power-of-two fraction of `desired` that divides `dim`, else dim."""
    t = desired
    while t >= 8:
        if dim % t == 0:
            return t
        t //= 2
    return dim


# ---------------------------------------------------------------------------
# Kernel 1: lm_head matmul  (M, H) @ (H, V) -> (M, V) bf16.
# 2-D tiled (rows x vocab), both axes "parallel"; vocab innermost so the row
# block stays resident; larger row tile cuts weight re-streaming.
# ---------------------------------------------------------------------------
def _lm_head_kernel(x_ref, w_ref, o_ref):
    o_ref[...] = jnp.dot(
        x_ref[...], w_ref[...], preferred_element_type=jnp.float32
    ).astype(o_ref.dtype)


def lm_head_matmul(x2d, w, tm=1024, tv=512):
    M, H = x2d.shape
    _, V = w.shape
    tm = _pick_tile(M, tm)
    tv = _pick_tile(V, tv)
    return pl.pallas_call(
        _lm_head_kernel,
        out_shape=jax.ShapeDtypeStruct((M, V), jnp.bfloat16),
        grid=(M // tm, V // tv),
        in_specs=[
            pl.BlockSpec((tm, H), lambda i, j: (i, 0)),
            pl.BlockSpec((H, tv), lambda i, j: (0, j)),
        ],
        out_specs=pl.BlockSpec((tm, tv), lambda i, j: (i, j)),
        compiler_params=pltpu.CompilerParams(
            dimension_semantics=("parallel", "parallel"),
            vmem_limit_bytes=_VMEM_LIMIT,
        ),
    )(x2d, w)


# ---------------------------------------------------------------------------
# Kernel 2: Medusa loss for ALL heads, streaming over vocab tiles.
# Grid: (batch, row-tile, vocab-tile); vocab is the reduction axis.
# One (tT + head_num, tV) base-logit slab is DMA'd per (b, n, v) group
# (double-buffered over v); draft rows and every head's (k+1)-shifted target
# rows are sliced from that slab in VMEM.  Target-side statistics are shared
# across heads; each head keeps its own draft online-softmax state.
# ---------------------------------------------------------------------------
def _make_loss_kernel(tT, tV, head_num, r, slab_rows):
    H8 = max(8, ((head_num + 7) // 8) * 8)

    def kernel(x_ref, a_ref, b_ref, base_hbm, out_ref,
               slab_buf, sem, xa_ref, et_ref, at_ref, fi_ref, nm_ref,
               m_t, l_t, m_d, l_d, s_td, d_hard):
        b = pl.program_id(0)
        n = pl.program_id(1)
        v = pl.program_id(2)
        n_v = pl.num_programs(2)
        row0 = n * tT                       # aligned slab start (multiple of tT)

        def start_slab(v_idx, slot):
            pltpu.make_async_copy(
                base_hbm.at[b, pl.ds(row0, slab_rows), pl.ds(v_idx * tV, tV)],
                slab_buf.at[slot],
                sem.at[slot],
            ).start()

        # ---- per-(batch, row-tile) init at the first vocab tile ----
        @pl.when(v == 0)
        def _():
            start_slab(0, 0)
            # xa_k = x @ A_k once per group, for every head, kept in VMEM.
            for k in range(head_num):
                xa_ref[k] = jnp.dot(
                    x_ref[0], a_ref[k], preferred_element_type=jnp.float32
                ).astype(xa_ref.dtype)
            m_t[...] = jnp.full_like(m_t, NEG_INF)
            l_t[...] = jnp.zeros_like(l_t)
            m_d[...] = jnp.full_like(m_d, NEG_INF)
            l_d[...] = jnp.zeros_like(l_d)
            s_td[...] = jnp.zeros_like(s_td)
            d_hard[...] = jnp.zeros_like(d_hard)

        slot = v & 1
        # wait for this vocab step's slab (double-buffered)
        pltpu.make_async_copy(
            base_hbm.at[b, pl.ds(row0, slab_rows), pl.ds(v * tV, tV)],
            slab_buf.at[slot],
            sem.at[slot],
        ).wait()

        # prefetch the next vocab tile into the other slot
        @pl.when(v + 1 < n_v)
        def _():
            start_slab(v + 1, 1 - slot)

        # slab holds draft rows [0, tT) and all target rows [1, head_num + tT)
        slab = slab_buf[slot].astype(jnp.float32)          # (slab_rows, tV)

        # ---- shared (head-independent) target statistics for this tile ----
        m_prev = m_t[...]                                  # (slab_rows, 1)
        t_max = jnp.max(slab, axis=-1, keepdims=True)
        m_new = jnp.maximum(m_prev, t_max)
        a_t = jnp.exp(m_prev - m_new)
        e_t = jnp.exp(slab - m_new)                        # (slab_rows, tV)
        l_t[...] = a_t * l_t[...] + jnp.sum(e_t, axis=-1, keepdims=True)
        m_t[...] = m_new

        iota = lax.broadcasted_iota(jnp.int32, slab.shape, 1)
        first = jnp.min(jnp.where(slab >= t_max, iota, 2 ** 30),
                        axis=-1, keepdims=True)            # within-tile argmax
        # stage shared stats in VMEM so per-head row-shifted slices are cheap
        # ref loads (pl.ds) instead of per-head HBM DMAs / recomputation.
        et_ref[...] = e_t
        at_ref[...] = a_t
        fi_ref[...] = first
        nm_ref[...] = (t_max > m_prev).astype(jnp.float32)

        base_draft = slab[:tT]                             # (tT, tV), aligned
        col = lax.broadcasted_iota(jnp.int32, (tT, tV), 1)

        # ---- per-head updates (static unrolled loop, shared slab) ----
        for k in range(head_num):
            off = k + 1
            lora = jnp.dot(xa_ref[k], b_ref[k],
                           preferred_element_type=jnp.float32)     # (tT, tV)
            d = base_draft + lora                                  # draft logits

            # draft online softmax (per head: d depends on LoRA_k)
            md_prev = m_d[k]
            d_max = jnp.max(d, axis=-1, keepdims=True)
            md_new = jnp.maximum(md_prev, d_max)
            a_d = jnp.exp(md_prev - md_new)
            l_d[k] = a_d * l_d[k] + jnp.sum(jnp.exp(d - md_new),
                                            axis=-1, keepdims=True)
            m_d[k] = md_new

            # soft-CE accumulator: sum_v exp(t - m_t) * d, rescaled online
            e_t_k = et_ref[pl.ds(off, tT), :]
            a_t_k = at_ref[pl.ds(off, tT), :]
            s_td[k] = a_t_k * s_td[k] + jnp.sum(e_t_k * d,
                                                axis=-1, keepdims=True)

            # hard label: draft logit at the target row's running argmax col
            # (first-occurrence tie-break within the tile; strict '>' across
            #  tiles -> matches jnp.argmax semantics).
            first_k = fi_ref[pl.ds(off, tT), :]
            new_k = nm_ref[pl.ds(off, tT), :] != 0.0
            d_at = jnp.sum(jnp.where(col == first_k, d, 0.0),
                           axis=-1, keepdims=True)
            d_hard[k] = jnp.where(new_k, d_at, d_hard[k])

        # ---- finalize: per-head row-sums into this group's output block ----
        @pl.when(v == n_v - 1)
        def _():
            rows = lax.broadcasted_iota(jnp.int32, (H8, 128), 0)
            acc = jnp.zeros((H8, 128), jnp.float32)
            for k in range(head_num):
                lse_d = m_d[k] + jnp.log(l_d[k])                   # (tT, 1)
                l_t_k = l_t[pl.ds(k + 1, tT), :]
                # soft CE: -sum_v softmax(t)_v * log_softmax(d)_v
                soft = lse_d - s_td[k] / l_t_k
                # hard CE: -log_softmax(d)[argmax(t)]
                # (torch applies log_softmax twice; the 2nd pass is a no-op
                #  and is dropped here.)
                hard = lse_d - d_hard[k]
                per_row = ALPHA * soft + (1.0 - ALPHA) * hard       # (tT, 1)
                acc = acc + jnp.where(rows == k, jnp.sum(per_row), 0.0)
            out_ref[0, 0] = acc

    return kernel


def medusa_loss(hidden_states, base_logits, a_stack, b_stack, head_num,
                tT=256, tV=2048):
    B, S, H = hidden_states.shape
    V = base_logits.shape[-1]
    T = S - head_num
    r = a_stack.shape[-1]
    tT = _pick_tile(T, tT)
    tV = _pick_tile(V, tV)
    nT = T // tT
    nV = V // tV
    slab_rows = tT + head_num          # draft rows + all shifted target rows
    H8 = max(8, ((head_num + 7) // 8) * 8)

    per_group = pl.pallas_call(
        _make_loss_kernel(tT, tV, head_num, r, slab_rows),
        out_shape=jax.ShapeDtypeStruct((B, nT, H8, 128), jnp.float32),
        grid=(B, nT, nV),
        in_specs=[
            # hidden states: draft rows all live in [0, T) -> blocked tiles
            pl.BlockSpec((1, tT, H), lambda b, n, v: (b, n, 0)),
            # LoRA A weights for all heads (tiny, resident)
            pl.BlockSpec((head_num, H, r), lambda b, n, v: (0, 0, 0)),
            # LoRA B vocab tile for all heads
            pl.BlockSpec((head_num, r, tV), lambda b, n, v: (0, 0, v)),
            # base logits stay in HBM: one shifted slab per (b, n, v) is
            # fetched with a manual double-buffered DMA inside the kernel.
            pl.BlockSpec(memory_space=pl.ANY),
        ],
        out_specs=pl.BlockSpec((1, 1, H8, 128), lambda b, n, v: (b, n, 0, 0)),
        scratch_shapes=[
            pltpu.VMEM((2, slab_rows, tV), base_logits.dtype),  # slab dbl buffer
            pltpu.SemaphoreType.DMA((2,)),
            pltpu.VMEM((head_num, tT, r), jnp.bfloat16),        # xa_k = x @ A_k
            pltpu.VMEM((slab_rows, tV), jnp.float32),           # e_t staging
            pltpu.VMEM((slab_rows, 1), jnp.float32),            # a_t staging
            pltpu.VMEM((slab_rows, 1), jnp.int32),              # argmax col staging
            pltpu.VMEM((slab_rows, 1), jnp.float32),            # new-max flag
            pltpu.VMEM((slab_rows, 1), jnp.float32),            # m_t (shared)
            pltpu.VMEM((slab_rows, 1), jnp.float32),            # l_t (shared)
            pltpu.VMEM((head_num, tT, 1), jnp.float32),         # m_d per head
            pltpu.VMEM((head_num, tT, 1), jnp.float32),         # l_d per head
            pltpu.VMEM((head_num, tT, 1), jnp.float32),         # s_td per head
            pltpu.VMEM((head_num, tT, 1), jnp.float32),         # d_hard per head
        ],
        compiler_params=pltpu.CompilerParams(
            dimension_semantics=("parallel", "parallel", "arbitrary"),
            vmem_limit_bytes=_VMEM_LIMIT,
        ),
    )(hidden_states, a_stack, b_stack, base_logits)

    sums = per_group[:, :, :head_num, 0]           # (B, nT, head_num) row-sums
    return jnp.sum(sums, axis=(0, 1)) / (B * T)    # per-head mean loss


# ---------------------------------------------------------------------------
# Full forward (glue in plain JAX, hot path in Pallas kernels).
# ---------------------------------------------------------------------------
def medusa_partial_forward(hidden_states, w, a_stack, b_stack, head_num,
                           tT=256, tV=2048):
    B, S, H = hidden_states.shape
    V = w.shape[1]
    base_logits = lm_head_matmul(hidden_states.reshape(B * S, H), w)
    base_logits = base_logits.reshape(B, S, V)
    per_head = medusa_loss(hidden_states, base_logits, a_stack, b_stack,
                           head_num, tT=tT, tV=tV)
    lambdas = jnp.asarray([LAMBDA_K ** (k + 1) for k in range(head_num)],
                          jnp.float32)
    return jnp.sum(lambdas * per_head)


# ---------------------------------------------------------------------------
# Pure-JAX reference mirroring the torch forward (given the same base logits).
# ---------------------------------------------------------------------------
def reference_loss(hidden_states, base_logits, a_stack, b_stack, head_num):
    B, S, H = hidden_states.shape
    T = S - head_num
    x = hidden_states[:, :T, :]
    base_draft = base_logits[:, :T, :].astype(jnp.float32)
    total = jnp.float32(0.0)
    for k in range(head_num):
        xa = jnp.einsum("bth,hr->btr", x, a_stack[k],
                        preferred_element_type=jnp.float32).astype(jnp.bfloat16)
        lora = jnp.einsum("btr,rv->btv", xa, b_stack[k],
                          preferred_element_type=jnp.float32)
        draft = base_draft + lora
        tgt = base_logits[:, k + 1:k + 1 + T, :].astype(jnp.float32)
        logp = jax.nn.log_softmax(draft, axis=-1)
        tprobs = jax.nn.softmax(tgt, axis=-1)
        hard = jnp.argmax(tgt, axis=-1)   # argmax(softmax(t)) == argmax(t)
        hard_loss = -jnp.mean(jnp.take_along_axis(logp, hard[..., None], axis=-1))
        soft_loss = -jnp.mean(jnp.sum(tprobs * logp, axis=-1))
        total += (LAMBDA_K ** (k + 1)) * (
            ALPHA * soft_loss + (1.0 - ALPHA) * hard_loss)
    return total


if __name__ == "__main__":
    # small, deterministic shapes: T = S - head_num = 16 rows per batch
    head_num = 5
    Bsz, S, H, V, r = 2, 21, 128, 2048, 8

    key = jax.random.PRNGKey(0)
    k_x, k_w, k_a, k_b = jax.random.split(key, 4)
    hidden_states = (0.5 * jax.random.normal(k_x, (Bsz, S, H))).astype(jnp.bfloat16)
    w = (0.1 * jax.random.normal(k_w, (H, V))).astype(jnp.bfloat16)          # lm_head
    a_stack = (0.1 * jax.random.normal(k_a, (head_num, H, r))).astype(jnp.bfloat16)
    b_stack = (0.1 * jax.random.normal(k_b, (head_num, r, V))).astype(jnp.bfloat16)

    # small vocab tile (512) so the demo exercises the streaming vocab loop
    loss = medusa_partial_forward(hidden_states, w, a_stack, b_stack, head_num,
                                  tT=256, tV=512)
    loss = jax.block_until_ready(loss)

    # correctness checks against pure-JAX references
    base_pal = lm_head_matmul(hidden_states.reshape(Bsz * S, H), w).reshape(Bsz, S, V)
    base_ref = jnp.einsum("bsh,hv->bsv", hidden_states.astype(jnp.float32),
                          w.astype(jnp.float32))
    np.testing.assert_allclose(np.asarray(base_pal, dtype=np.float32),
                               np.asarray(base_ref), rtol=5e-2, atol=5e-2)

    ref = jax.block_until_ready(
        reference_loss(hidden_states, base_pal, a_stack, b_stack, head_num))
    np.testing.assert_allclose(np.asarray(loss), np.asarray(ref),
                               rtol=1e-2, atol=1e-2)
    print("KERNEL_OK")
</pallas_src>

<mosaic_0001>
module attributes {stable_mosaic.version = 11 : i64} {
  func.func @_lm_head_kernel(%arg0: i32, %arg1: i32, %arg2: memref<42x128xbf16, #tpu.memory_space<vmem>>, %arg3: memref<128x512xbf16, #tpu.memory_space<vmem>>, %arg4: memref<42x512xbf16, #tpu.memory_space<vmem>>) attributes {dimension_semantics = [#tpu.dimension_semantics<parallel>, #tpu.dimension_semantics<parallel>], iteration_bounds = array<i64: 1, 4>, scalar_prefetch = 0 : i64, scratch_operands = 0 : i64, tpu.core_type = #tpu.core_type<tc>, window_params = [{transform_indices = @transform_0, window_bounds = array<i64: 42, 128>}, {transform_indices = @transform_1, window_bounds = array<i64: 128, 512>}, {transform_indices = @transform_2, window_bounds = array<i64: 42, 512>}]} {
    %c0 = arith.constant 0 : index
    %c0_0 = arith.constant 0 : index
    %0 = vector.load %arg2[%c0, %c0_0] : memref<42x128xbf16, #tpu.memory_space<vmem>>, vector<42x128xbf16>
    %c0_1 = arith.constant 0 : index
    %c0_2 = arith.constant 0 : index
    %1 = vector.load %arg3[%c0_1, %c0_2] : memref<128x512xbf16, #tpu.memory_space<vmem>>, vector<128x512xbf16>
    %cst = arith.constant dense<0.000000e+00> : vector<42x512xf32>
    %2 = tpu.matmul %0, %1, %cst {dimension_numbers = #tpu.dot_dimension_numbers<[1], [0], [0], [1], [0, 0, 1, 1], [], []>} : vector<42x128xbf16>, vector<128x512xbf16>, vector<42x512xf32> -> vector<42x512xf32>
    %3 = arith.truncf %2 : vector<42x512xf32> to vector<42x512xbf16>
    %c0_3 = arith.constant 0 : index
    %c0_4 = arith.constant 0 : index
    %4 = vector.load %arg4[%c0_3, %c0_4] : memref<42x512xbf16, #tpu.memory_space<vmem>>, vector<42x512xbf16>
    tpu.vector_store %arg4[%c0_3, %c0_4], %3 {strides = array<i32>} : memref<42x512xbf16, #tpu.memory_space<vmem>>, vector<42x512xbf16>,
    return
  }
  func.func @transform_0(%arg0: i32, %arg1: i32) -> (i32, i32) {
    %c0_i32 = arith.constant 0 : i32
    %c0_i32_0 = arith.constant 0 : i32
    return %arg0, %c0_i32 : i32, i32
  }
  func.func @transform_1(%arg0: i32, %arg1: i32) -> (i32, i32) {
    %c0_i32 = arith.constant 0 : i32
    %c0_i32_0 = arith.constant 0 : i32
    return %c0_i32, %arg1 : i32, i32
  }
  func.func @transform_2(%arg0: i32, %arg1: i32) -> (i32, i32) {
    %c0_i32 = arith.constant 0 : i32
    return %arg0, %arg1 : i32, i32
  }
}

</mosaic_0001>

<bundles_post_ra>
// kernel: tpu_custom_call.1
= control target key start
LH: loop header
LB: loop body
LE: loop exit
PB: predicated region body
PF: predicated region fallthrough
CT: control target
= control target key end

     0   :  { %7 = vsyncpa [#allocation3], 0  ;;  %s1351_s0 = inlined_call_operand.hbm [shape: bf16[42,128], index: 0, kind: input, shape index: {}]   ;;  %s1352_s1 = inlined_call_operand.hbm [shape: bf16[128,2048], index: 1, kind: input, shape index: {}]   ;;  %s1353_s2 = inlined_call_operand.hbm [shape: bf16[42,2048], index: 2, kind: output, shape index: {}]  }
   0x1   :  { %8 = vsyncpa [#allocation6], 0 }
   0x2   :  { %10 = vsyncpa [#allocation6 + $0x1], 0 }
   0x3   :  { %11 = vsyncpa [#allocation4], 0 }
   0x4   :  { %13 = vsyncpa [#allocation4 + $0x1], 0  ;;  %s1122_s9 = smov 0   ;;  %s1124_s10 = smov 0  }
   0x5   :  { %s1126_s11 = smov 0   ;;  %s1128_s12 = smov 0  }
   0x6   :  { %s1130_s13 = smov 0   ;;  %s1132_s14 = smov 0  }
   0x7 LB: > { %s745_s15 = sadd.s32 4294967295, %s1093_s14   ;;  %s746_s16 = sadd.s32 4294967294, %s1093_s14   ;;  %s1093_s14 = sphi %s1132_s14, %s19_s14   ;;  %s1089_s13 = sphi %s1130_s13, %s1374_s13   ;;  %s1085_s12 = sphi %s1128_s12, %s1373_s12   ;;  %s1081_s11 = sphi %s1126_s11, %s1372_s11   ;;  %s1077_s10 = sphi %s1124_s10, %s1371_s10   ;;  %s1073_s9 = sphi %s1122_s9, %s1370_s9  }
   0x8   : > { %p71_p0 = scmp.ne.s32.totalorder %s1081_s11, %s1077_s10  ;;  %p72_p1 = scmp.eq.s32.totalorder %s1093_s14, 0 }
   0x9   : > { %p77_p2 = scmp.ne.s32.totalorder %s1077_s10, %s1073_s9  ;;  %p1159_p3 = scmp.eq.s32.totalorder %s745_s15, 0 }
   0xa   : > { %p1163_p4 = por %p72_p1, %p71_p0  ;;  %p103_p5 = scmp.eq.s32.totalorder %s745_s15, 3 }
   0xb   : > { %p1169_p6 = por %p1159_p3, %p77_p2  ;;  %p109_p7 = scmp.eq.s32.totalorder %s746_s16, 3 }
   0xc   : > { %p1173_p8 = por %p103_p5, %p71_p0  ;;  %p747_p9 = scmp.ge.s32.totalorder %s1093_s14, 1 }
   0xd   : > { %s1359_s19 = scalar_select %p1169_p6, 1, 0 }
   0xe   : > { %s1360_s20 = scalar_select %p1173_p8, 1, 0 }
   0xf   : > { %p1178_p10 = por %p109_p7, %p77_p2  ;;  %p116_p11 = scmp.lt.s32.totalorder %s1093_s14, 5 }
  0x10   : > { %s1095_s23 = smov [#allocation2]   ;;  %p843_p0 = scmp.lt.s32.totalorder %s1093_s14, 4 }
  0x11   : > { %s1361_s21 = scalar_select %p1178_p10, 1, 0 }
  0x12   : > { %p1183_p12 = pnand %p747_p9, %p116_p11  ;;  %s131_s24 = sshll.u32 %s1095_s23, 4  ;;  %s132_s24 = int_to_ptr.vmem [resolvable:$true] %s131_s24 }
  0x13   : > { %1362 = sst [smem:[#allocation11_spill]] %s1361_s21  ;;  %p1198_p2 = pnand %p843_p0, %p1163_p4 }
  0x14   : > { %p830_p13 = pneg %p1183_p12  ;;  %s28_s27 = sadd.s32 1, %s1089_s13 }
  0x15   : > { %s966_s28 = scalar_lea.vmem %s132_s24, 384  ;;  %p974_p10 = scmp.lt.s32.totalorder %s132_s24, %s132_s24 }
  0x16   : > { %p1192_p1 = pnand %p830_p13, %p1159_p3  ;;  %p967_p7 = scmp.ne.s32.totalorder %s132_s24, %s966_s28 }
  0x17   : > { %p975_p8 = scmp.lt.s32.totalorder %s966_s28, %s966_s28 }
  0x18   : > { %p957_p5 = pneg %p1192_p1 }
  0x19   : > { %p976_p6 = por %p975_p8, %p974_p10 }
  0x1a   : > { %p969_p9 = pnand %p967_p7, %p957_p5 }
  0x1c   : > { %p970_p11 = pneg %p969_p9 }
  0x1e   : > { %p977_p13 = pnand %p976_p6, %p970_p11 }
  0x20   : > { %980 = shalt.err (!%p977_p13)
}
  0x21   : > { %s1096_s29 = smov 64   ;;  %s1097_s30 = smov 4  }
  0x22   : > { %833 = dma.hbm_to_vmem [thread:$0]  (!%p1192_p1), %s1351_s0, 384, %s132_s24, [#allocation3], %s1096_s29, %s1096_s29, %s1097_s30  }
  0x23   : > { %p29_p4 = scmp.ge.s32.totalorder %s28_s27, 4  ;;  %s64_s5 = sadd.s32 1, %s1081_s11 }
  0x24   : > { %s145_s6 = sand.u32 1, %s1081_s11   ;;  %s807_s15 = sshll.u32 %s1089_s13, 8 }
  0x25   : > { %s1376_s27 = smov (%p29_p4, %s28_s27), 0  ;;  %s750_s7 = sshll.u32 %s145_s6, 8 }
  0x26   : > { %s61_s8 = ssub.s32 %s1089_s13, %s1376_s27  ;;  %s155_s23 = scalar_lea.hbm %s1352_s1, %s807_s15 }
  0x27   : > { %p62_p6 = scmp.eq.s32.totalorder %s61_s8, 0  ;;  %s149_s25 = scalar_lea.vmem [#allocation5], %s750_s7 }
  0x28   : > { %s156_s28 = sshll.u32 %s149_s25, 4  ;;  %s146_s24 = scalar_lea.sflag [#allocation6], %s145_s6  ;;  %s157_s28 = int_to_ptr.vmem [resolvable:$true] %s156_s28 }
  0x29   : > { %s1221_s21 = scalar_select %p62_p6, %s1081_s11, %s64_s5  }
  0x2a   : > { %p983_p8 = pneg %p1198_p2  ;;  %s994_s29 = scalar_lea.vmem %s157_s28, 4096 }
  0x2b   : > { %p995_p10 = scmp.ne.s32.totalorder %s157_s28, %s994_s29  ;;  %s1098_s30 = smov [#allocation5]  }
  0x2c   : > { %s999_s3 = sshll.u32 %s1098_s30, 4  ;;  %s1000_s3 = int_to_ptr.vmem [resolvable:$false] %s999_s3 }
  0x2d   : > { %p997_p0 = pnand %p995_p10, %p983_p8  ;;  %s1001_s4 = scalar_lea.vmem %s1000_s3, 8192 }
  0x2e   : > { %p1002_p5 = scmp.lt.s32.totalorder %s157_s28, %s1000_s3  ;;  %p1003_p7 = scmp.lt.s32.totalorder %s1001_s4, %s994_s29 }
  0x2f   : > { %p998_p1 = pneg %p997_p0 }
  0x30   : > { %p1004_p9 = por %p1003_p7, %p1002_p5 }
  0x32   : > { %p1005_p11 = pnand %p1004_p9, %p998_p1 }
  0x34   : > { %1008 = shalt.err (!%p1005_p11)
}
  0x35   : > { %s1099_s7 = smov 1024   ;;  %s1100_s5 = smov 256  }
  0x36   : > { %s1101_s8 = smov 16   ;;  %168 = sbr.rel (%p1183_p12) target bundleno = 330 (0x14a), region = 28 }
  0x37   : > { %837 = dma.hbm_to_vmem [thread:$0]  (!%p1198_p2), %s155_s23, 4096, %s157_s28, %s146_s24, %s1099_s7, %s1100_s5, %s1101_s8  }
  0x3b   : > { %1060 = dma.done.wait (%p1159_p3), [#allocation3], 384  }
  0x3c   : > { %1062 = vsyncadd (%p1159_p3), [#allocation3], 4294966912  ;;  %s1234_s6 = sand.u32 1, %s1077_s10   ;;  %p1366_p2 = scmp.ne.s32.totalorder %s1359_s19, 0 }
  0x3d   : > { %s755_s15 = sshll.u32 %s1234_s6, 8  ;;  %s175_s16 = scalar_lea.sflag [#allocation6], %s1234_s6 }
  0x3e   : > { %s1238_s18 = scalar_lea.vmem [#allocation5], %s755_s15 }
  0x3f   : > { %1064 = dma.done.wait (%p1366_p2), %s175_s16, 4096  }
  0x40   : > { %1066 = vsyncadd (%p1366_p2), %s175_s16, 4294963200  ;;  %v1102_v0 = vmov 0   ;;  %v904_v1 = vld [vmem:[%s1238_s18 + $0xe4] ss:$16 sps:$4 sm:$0xff]   ;;  %v906_v2 = vld [vmem:[%s1238_s18 + $0xec] ss:$16 sps:$4 sm:$0xff]  }
  0x41   : > { %452 = vmatprep.mubr.bf16.mxu0 %v1102_v0  ;;  %515 = vmatprep.mubr.bf16.mxu1 %v1102_v0  ;;  %v908_v3 = vld [vmem:[%s1238_s18 + $0xe0] ss:$16 sps:$4 sm:$0xff]   ;;  %v909_v4 = vld [vmem:[%s1238_s18 + $0xe8] ss:$16 sps:$4 sm:$0xff]   ;;  %v910_v5 = vld [vmem:[%s1238_s18 + $0xc4] ss:$16 sps:$4 sm:$0xff]  }
  0x42   : > { %420 = vmatprep.subr.bf16.mxu0 %v904_v1  ;;  %483 = vmatprep.subr.bf16.mxu1 %v906_v2  ;;  %v912_v6 = vld [vmem:[%s1238_s18 + $0xcc] ss:$16 sps:$4 sm:$0xff]   ;;  %v914_v7 = vld [vmem:[%s1238_s18 + $0xc0] ss:$16 sps:$4 sm:$0xff]   ;;  %v915_v8 = vld [vmem:[%s1238_s18 + $0xc8] ss:$16 sps:$4 sm:$0xff]  }
  0x43   : > { %421 = vmatpush1.bf16.msra.mxu0 %v908_v3  ;;  %484 = vmatpush1.bf16.msra.mxu1 %v909_v4  ;;  %v916_v9 = vld [vmem:[%s1238_s18 + $0xa4] ss:$16 sps:$4 sm:$0xff]   ;;  %v918_v10 = vld [vmem:[%s1238_s18 + $0xac] ss:$16 sps:$4 sm:$0xff]   ;;  %v920_v11 = vld [vmem:[%s1238_s18 + $0xa0] ss:$16 sps:$4 sm:$0xff]  }
  0x44   : > { %422 = vmatprep.subr.bf16.mxu0 %v910_v5  ;;  %485 = vmatprep.subr.bf16.mxu1 %v912_v6  ;;  %v921_v12 = vld [vmem:[%s1238_s18 + $0xa8] ss:$16 sps:$4 sm:$0xff]   ;;  %v922_v13 = vld [vmem:[%s1238_s18 + $0x84] ss:$16 sps:$4 sm:$0xff]   ;;  %v924_v14 = vld [vmem:[%s1238_s18 + $0x8c] ss:$16 sps:$4 sm:$0xff]  }
  0x45   : > { %v926_v15 = vld [vmem:[%s1238_s18 + $0x80] ss:$16 sps:$4 sm:$0xff]   ;;  %v927_v16 = vld [vmem:[%s1238_s18 + $0x88] ss:$16 sps:$4 sm:$0xff]   ;;  %v928_v17 = vld [vmem:[%s1238_s18 + $0x64] ss:$16 sps:$4 sm:$0xff]  }
  0x46   : > { %v930_v18 = vld [vmem:[%s1238_s18 + $0x6c] ss:$16 sps:$4 sm:$0xff]   ;;  %v932_v19 = vld [vmem:[%s1238_s18 + $0x60] ss:$16 sps:$4 sm:$0xff]   ;;  %v933_v20 = vld [vmem:[%s1238_s18 + $0x68] ss:$16 sps:$4 sm:$0xff]  }
  0x47   : > { %423 = vmatpush1.bf16.msra.mxu0 %v914_v7  ;;  %486 = vmatpush1.bf16.msra.mxu1 %v915_v8  ;;  %v934_v21 = vld [vmem:[%s1238_s18 + $0x44] ss:$16 sps:$4 sm:$0xff]   ;;  %v936_v22 = vld [vmem:[%s1238_s18 + $0x4c] ss:$16 sps:$4 sm:$0xff]   ;;  %v938_v23 = vld [vmem:[%s1238_s18 + $0x40] ss:$16 sps:$4 sm:$0xff]  }
  0x48   : > { %424 = vmatprep.subr.bf16.mxu0 %v916_v9  ;;  %487 = vmatprep.subr.bf16.mxu1 %v918_v10  ;;  %v939_v24 = vld [vmem:[%s1238_s18 + $0x48] ss:$16 sps:$4 sm:$0xff]   ;;  %v940_v25 = vld [vmem:[%s1238_s18 + $0x24] ss:$16 sps:$4 sm:$0xff]   ;;  %v942_v26 = vld [vmem:[%s1238_s18 + $0x2c] ss:$16 sps:$4 sm:$0xff]  }
  0x49   : > { %v944_v27 = vld [vmem:[%s1238_s18 + $0x20] ss:$16 sps:$4 sm:$0xff]   ;;  %v945_v28 = vld [vmem:[%s1238_s18 + $0x28] ss:$16 sps:$4 sm:$0xff]   ;;  %v946_v29 = vld [vmem:[%s1238_s18 + $0x4] ss:$16 sps:$4 sm:$0xff]  }
  0x4a   : > { %v948_v30 = vld [vmem:[%s1238_s18 + $0xc] ss:$16 sps:$4 sm:$0xff]   ;;  %v950_v31 = vld [vmem:[%s1238_s18] ss:$16 sps:$4 sm:$0xff]   ;;  %v951_v32 = vld [vmem:[%s1238_s18 + $0x8] ss:$16 sps:$4 sm:$0xff]  }
  0x4b   : > { %425 = vmatpush1.bf16.msra.mxu0 %v920_v11  ;;  %488 = vmatpush1.bf16.msra.mxu1 %v921_v12  ;;  %v952_v33 = vld [vmem:[#allocation2] sm:$0xff]   ;;  %v953_v34 = vld [vmem:[#allocation2 + $0x8] sm:$0xff]   ;;  %v954_v35 = vld [vmem:[#allocation2 + $0x10] sm:$0x1f]   ;;  %s821_s17 = smul.u32 96, %s1234_s6  ;;  %s820_s22 = sshll.u32 %s1085_s12, 8 }
  0x4c   : > { %426 = vmatprep.subr.bf16.mxu0 %v922_v13  ;;  %489 = vmatprep.subr.bf16.mxu1 %v924_v14  ;;  %s1300_s28 = scalar_lea.hbm %s1353_s2, %s820_s22  ;;  %s631_s12 = scalar_lea.sflag [#allocation4], %s1234_s6 }
  0x4d   : > { %s1283_s19 = scalar_lea.vmem [#allocation7], %s821_s17  ;;  %p1367_p12 = scmp.ne.s32.totalorder %s1360_s20, 0 }
  0x4e   : > { %s647_s26 = sshll.u32 %s1283_s19, 4  ;;  %s1103_s29 = smov [#allocation7]   ;;  %s1302_s26 = int_to_ptr.vmem [resolvable:$true] %s647_s26 }
  0x4f   : > { %427 = vmatpush1.bf16.msra.mxu0 %v926_v15  ;;  %490 = vmatpush1.bf16.msra.mxu1 %v927_v16  ;;  %s1009_s24 = scalar_lea.vmem %s1302_s26, 1536  ;;  %s1013_s30 = sshll.u32 %s1103_s29, 4  ;;  %s1014_s30 = int_to_ptr.vmem [resolvable:$false] %s1013_s30 }
  0x50   : > { %428 = vmatprep.subr.bf16.mxu0 %v928_v17  ;;  %491 = vmatprep.subr.bf16.mxu1 %v930_v18  ;;  %p1010_p3 = scmp.ne.s32.totalorder %s1302_s26, %s1009_s24  ;;  %s1015_s3 = scalar_lea.vmem %s1014_s30, 3072 }
  0x51   : > { %p1016_p6 = scmp.lt.s32.totalorder %s1302_s26, %s1014_s30  ;;  %p1017_p8 = scmp.lt.s32.totalorder %s1015_s3, %s1009_s24 }
  0x52   : > { %p1011_p13 = pnand %p1010_p3, %p1367_p12 }
  0x53   : > { %429 = vmatpush1.bf16.msra.mxu0 %v932_v19  ;;  %492 = vmatpush1.bf16.msra.mxu1 %v933_v20  ;;  %p1018_p10 = por %p1017_p8, %p1016_p6 }
  0x54   : > { %430 = vmatprep.subr.bf16.mxu0 %v934_v21  ;;  %493 = vmatprep.subr.bf16.mxu1 %v936_v22  ;;  %p1012_p4 = pneg %p1011_p13 }
  0x56   : > { %p1019_p0 = pnand %p1018_p10, %p1012_p4 }
  0x57   : > { %431 = vmatpush1.bf16.msra.mxu0 %v938_v23  ;;  %494 = vmatpush1.bf16.msra.mxu1 %v939_v24 }
  0x58   : > { %432 = vmatprep.subr.bf16.mxu0 %v940_v25  ;;  %495 = vmatprep.subr.bf16.mxu1 %v942_v26 }
  0x5b   : > { %433 = vmatpush1.bf16.msra.mxu0 %v944_v27  ;;  %496 = vmatpush1.bf16.msra.mxu1 %v945_v28 }
  0x5c   : > { %434 = vmatprep.subr.bf16.mxu0 %v946_v29  ;;  %497 = vmatprep.subr.bf16.mxu1 %v948_v30 }
  0x5f   : > { %435 = vmatpush1.bf16.msra.mxu0 %v950_v31  ;;  %498 = vmatpush1.bf16.msra.mxu1 %v951_v32 }
  0x62   : > { %453 = vmatmul.mubr.bf16.vlgmr.msra.gmra.mxu0 %v952_v33  ;;  %516 = vmatmul.mubr.bf16.vlgmr.msra.gmra.mxu1 %v952_v33 }
  0x63   : > { %462 = vmatprep.mubr.bf16.mxu0 %v1102_v0  ;;  %525 = vmatprep.mubr.bf16.mxu1 %v1102_v0 }
  0x6a   : > { %463 = vmatmul.mubr.bf16.gmra.mxu0 %v953_v34  ;;  %526 = vmatmul.mubr.bf16.gmra.mxu1 %v953_v34 }
  0x6b   : > { %472 = vmatprep.mubr.bf16.mxu0 %v1102_v0  ;;  %535 = vmatprep.mubr.bf16.mxu1 %v1102_v0 }
  0x72   : > { %473 = vmatmul.mubr.bf16.gmra.mxu0 %v954_v35  ;;  %536 = vmatmul.mubr.bf16.gmra.mxu1 %v954_v35 }
 0x122   : > { %v454_v36 = vpop.f32.mrf.mxu0  ;;  %v517_v37 = vpop.f32.mrf.mxu1 }
 0x124   : > { %v456_v38 = vpop.f32.mrf.mxu0  ;;  %v519_v39 = vpop.f32.mrf.mxu1 }
 0x125   : > { %v808_v40 = vpack.c.bf16 %v456_v38, %v454_v36  ;;  %v809_v41 = vpack.c.bf16 %v519_v39, %v517_v37 }
 0x126   : > { %v458_v42 = vpop.f32.mrf.mxu0  ;;  %v521_v43 = vpop.f32.mrf.mxu1 }
 0x127   : > { %618 = vst [vmem:[%s1283_s19] sm:$0xff] %v808_v40  ;;  %619 = vst [vmem:[%s1283_s19 + $0x8] sm:$0xff] %v809_v41 }
 0x128   : > { %v460_v44 = vpop.f32.mrf.mxu0  ;;  %v523_v45 = vpop.f32.mrf.mxu1 }
 0x129   : > { %v810_v46 = vpack.c.bf16 %v460_v44, %v458_v42  ;;  %v811_v47 = vpack.c.bf16 %v523_v45, %v521_v43 }
 0x12a   : > { %v464_v48 = vpop.f32.mrf.mxu0  ;;  %v527_v49 = vpop.f32.mrf.mxu1 }
 0x12b   : > { %620 = vst [vmem:[%s1283_s19 + $0x10] sm:$0xff] %v810_v46  ;;  %621 = vst [vmem:[%s1283_s19 + $0x18] sm:$0xff] %v811_v47 }
 0x12c   : > { %v466_v50 = vpop.f32.mrf.mxu0  ;;  %v529_v51 = vpop.f32.mrf.mxu1 }
 0x12d   : > { %v812_v52 = vpack.c.bf16 %v466_v50, %v464_v48  ;;  %v813_v53 = vpack.c.bf16 %v529_v51, %v527_v49 }
 0x12e   : > { %v468_v54 = vpop.f32.mrf.mxu0  ;;  %v531_v55 = vpop.f32.mrf.mxu1 }
 0x12f   : > { %622 = vst [vmem:[%s1283_s19 + $0x20] sm:$0xff] %v812_v52  ;;  %623 = vst [vmem:[%s1283_s19 + $0x28] sm:$0xff] %v813_v53 }
 0x130   : > { %v470_v56 = vpop.f32.mrf.mxu0  ;;  %v533_v57 = vpop.f32.mrf.mxu1 }
 0x131   : > { %v814_v58 = vpack.c.bf16 %v470_v56, %v468_v54  ;;  %v815_v59 = vpack.c.bf16 %v533_v57, %v531_v55 }
 0x132   : > { %v474_v60 = vpop.f32.mrf.mxu0  ;;  %v537_v61 = vpop.f32.mrf.mxu1 }
 0x133   : > { %624 = vst [vmem:[%s1283_s19 + $0x30] sm:$0xff] %v814_v58  ;;  %625 = vst [vmem:[%s1283_s19 + $0x38] sm:$0xff] %v815_v59 }
 0x134   : > { %v476_v62 = vpop.f32.mrf.mxu0  ;;  %v539_v63 = vpop.f32.mrf.mxu1 }
 0x135   : > { %v816_v0 = vpack.c.bf16 %v476_v62, %v474_v60  ;;  %v817_v1 = vpack.c.bf16 %v539_v63, %v537_v61 }
 0x136   : > { %v478_v2 = vpop.f32.mrf.mxu0  ;;  %v541_v3 = vpop.f32.mrf.mxu1 }
 0x137   : > { %626 = vst [vmem:[%s1283_s19 + $0x40] sm:$0xff] %v816_v0  ;;  %627 = vst [vmem:[%s1283_s19 + $0x48] sm:$0xff] %v817_v1 }
 0x138   : > { %v480_v4 = vpop.f32.mrf.mxu0  ;;  %v543_v5 = vpop.f32.mrf.mxu1 }
 0x139   : > { %v818_v6 = vpack.c.bf16 %v480_v4, %v478_v2  ;;  %v819_v7 = vpack.c.bf16 %v543_v5, %v541_v3 }
 0x13b   : > { %628 = vst [vmem:[%s1283_s19 + $0x50] sm:$0x11] %v818_v6  ;;  %629 = vst [vmem:[%s1283_s19 + $0x58] sm:$0x11] %v819_v7 }
 0x13c   : > { %1022 = shalt.err (!%p1019_p0)
}
 0x13d   : > { %s1023_s4 = scalar_lea.hbm %s1300_s28, 1536  ;;  %s1027_s8 = scalar_lea.hbm %s1353_s2, 6144 }
 0x13e   : > { %p1024_p1 = scmp.ne.s32.totalorder %s1300_s28, %s1023_s4  ;;  %p1028_p9 = scmp.lt.s32.totalorder %s1300_s28, %s1353_s2 }
 0x13f   : > { %p1029_p11 = scmp.lt.s32.totalorder %s1027_s8, %s1023_s4 }
 0x140   : > { %p1025_p5 = pnand %p1024_p1, %p1367_p12 }
 0x141   : > { %p1030_p2 = por %p1029_p11, %p1028_p9 }
 0x142   : > { %p1026_p7 = pneg %p1025_p5 }
 0x144   : > { %p1031_p3 = pnand %p1030_p2, %p1026_p7 }
 0x146   : > { %1034 = shalt.err (!%p1031_p3)
}
 0x147   : > { %s1104_s18 = smov 256   ;;  %s1105_s17 = smov 1024  }
 0x148   : > { %s1106_s19 = smov 16  }
 0x149   : > { %828 = dma.vmem_to_hbm [thread:$0]  (%p1367_p12), %s1302_s26, 1536, %s1300_s28, %s631_s12, %s1104_s18, %s1105_s17, %s1106_s19  }
 0x14a PF: > { %s1368_s22 = sld [smem:[#allocation11_spill]]  ;;  %p845_p13 = scmp.ge.s32.totalorder %s1093_s14, 2 }
 0x14b   : > { %s662_s23 = sand.u32 1, %s1073_s9  }
 0x14c   : > { %s663_s25 = scalar_lea.sflag [#allocation4], %s662_s23 }
 0x150   : > { %p1369_p4 = scmp.ne.s32.totalorder %s1368_s22, 0 }
 0x152   : > { %p839_p6 = pnand %p845_p13, %p1369_p4 }
 0x154   : > { %p840_p8 = pneg %p839_p6 }
 0x156   : > { %1068 = dma.done.wait (%p840_p8), %s663_s25, 1536  }
 0x157   : > { %1070 = vsyncadd (%p840_p8), %s663_s25, 4294965760  ;;  %s19_s14 = sadd.s32 1, %s1093_s14   ;;  %s1370_s9 = smov %s1077_s10 }
 0x158   : > { %p16_p10 = scmp.ge.s32.totalorder %s19_s14, 6   ;;  %s1371_s10 = smov %s1081_s11 }
 0x159   : > { %s1372_s11 = smov %s1221_s21  ;;  %s1373_s12 = smov %s1089_s13 }
 0x15a   : > { %s1374_s13 = smov %s1376_s27  ;;  %18 = sbr.rel (!%p16_p10) target bundleno = 7 (0x7), region = 79 }
 0x15f   :  { %668 = vsyncpa [#allocation3], 1 }
 0x160   :  { %670 = vsyncpa [#allocation3 + $0x1], 1 }
 0x161   :  { %671 = vsyncpa [#allocation6], 1 }
 0x162   :  { %673 = vsyncpa [#allocation6 + $0x1], 1 }
 0x163   :  { %674 = vsyncpa [#allocation4], 1 }
 0x164   :  { %676 = vsyncpa [#allocation4 + $0x1], 1 }

</bundles_post_ra>
